<compile_context>
chip_gen: v7x
topology: tpu7x:2x2x1
jax: 0.10.0
libtpu: 0.0.40
codegen_flags: <defaults>
</compile_context>

<pallas_src>
import jax
import jax.numpy as jnp
import numpy as np
from jax import lax
from jax.experimental import pallas as pl
from jax.experimental.pallas import tpu as pltpu


def _cdiv(a, b):
    return -(-a // b)


def _round_up(v, m):
    return _cdiv(v, m) * m


def _make_adpool_kernel(c, c_chunk, n_chunks):
    inv_c = np.float32(1.0 / c)
    inv_cm1 = np.float32(1.0 / (c - 1))

    def kernel(coef_ref, x_ref, o_ref):
        # coef_ref: SMEM (2,) f32 : [0.5 + sigmoid(w0), 0.5 + sigmoid(w1)]
        # x_ref:    VMEM (bn, C, hw_tile)  (input dtype; upcast to f32 per chunk)
        # o_ref:    VMEM (bn, hw_tile)     (input dtype)
        if n_chunks == 1:
            # Whole-tile two-pass (small C): exact torch-style unbiased std.
            x = x_ref[...].astype(jnp.float32)            # (bn, C, hw_tile)
            mean = jnp.sum(x, axis=1) * inv_c             # (bn, hw_tile)
            d = x - mean[:, None, :]
            ssq = jnp.sum(d * d, axis=1)
        else:
            # Chunked two-pass: bounds f32 temps to (bn, c_chunk, hw_tile)
            # regardless of C, which is what lets hw_tile stay large in VMEM.
            bn_, _, hwt = x_ref.shape
            zero = jnp.zeros((bn_, hwt), jnp.float32)
            unroll = n_chunks <= 8

            def load(i):
                start = pl.multiple_of(i * c_chunk, c_chunk)
                return x_ref[:, pl.ds(start, c_chunk), :].astype(jnp.float32)

            s = lax.fori_loop(0, n_chunks,
                              lambda i, acc: acc + jnp.sum(load(i), axis=1),
                              zero, unroll=unroll)
            mean = s * inv_c

            def ssq_body(i, acc):
                d = load(i) - mean[:, None, :]
                return acc + jnp.sum(d * d, axis=1)

            ssq = lax.fori_loop(0, n_chunks, ssq_body, zero, unroll=unroll)

        # Clamp guards edge-block garbage / f32 rounding; valid lanes are exact.
        std = jnp.sqrt(jnp.maximum(ssq * inv_cm1, 0.0))
        o_ref[...] = (coef_ref[0] * std + coef_ref[1] * mean).astype(o_ref.dtype)

    return kernel


def _vmem_defaults():
    """Per-generation (tile budget, scoped vmem limit) in bytes."""
    try:
        cap = int(getattr(pltpu.get_tpu_info(), "vmem_capacity_bytes", 64 << 20))
    except Exception:
        cap = 64 << 20                       # assume the smallest (v7x per-TC)
    if cap <= (64 << 20):                    # v7x: 64 MiB per TC, 2 TCs share HBM
        return 10 << 20, 48 << 20
    return 20 << 20, 64 << 20                # v5e / v6e: 128 MiB physical VMEM


def adpool(x, weight, *, vmem_tile_budget_bytes=None, vmem_limit_bytes=None):
    """ADPool forward. x: (N, C, H, W); weight: (2,) raw params. Returns (N, 1, H, W) in x.dtype."""
    n, c, h, w = x.shape
    assert c > 1, "ADPool std (ddof=1) requires C > 1"
    hw = h * w

    default_budget, default_limit = _vmem_defaults()
    budget = default_budget if vmem_tile_budget_bytes is None else vmem_tile_budget_bytes
    vmem_limit = default_limit if vmem_limit_bytes is None else vmem_limit_bytes

    # Batch rows per grid step: fill the 8 output sublanes when possible.
    bn = 8 if n >= 8 else n

    # Reduction strategy: chunk C for large channel counts (bounds f32 temps).
    c_chunk_base = 8
    chunked = (c % c_chunk_base == 0) and (c >= 8 * c_chunk_base)
    c_chunk = c_chunk_base if chunked else c
    n_chunks = c // c_chunk

    # --- VMEM accounting per lane column (everything that scales with hw_tile) ---
    in_item = jnp.dtype(x.dtype).itemsize
    out_item = in_item                                    # output written in x.dtype
    c_pad = _round_up(c, 8)                               # sublane padding of C in VMEM
    tmp_rows = c_chunk if chunked else c_pad              # in-kernel f32 upcast + diff temps
    per_lane = bn * (2 * c_pad * in_item                  # double-buffered input tile
                     + 2 * tmp_rows * 4                   # f32 temps (x upcast, x - mean)
                     + 2 * out_item                       # double-buffered output tile
                     + 8 * 4)                             # mean/ssq/std accumulator rows
    budget_tile = (budget // per_lane) // 128 * 128
    if budget_tile < 512:
        # Prefer >= 512-lane tiles: trade VMEM budget (up to ~60% of the scoped
        # limit) before shrinking the tile below 512 lanes.
        budget = min(max(budget, 512 * per_lane), int(vmem_limit * 0.6))
        budget_tile = (budget // per_lane) // 128 * 128
    budget_tile = max(128, budget_tile)

    # Balance the tail across grid steps instead of rounding HW up to a full
    # budget_tile (avoids up-to-~2x redundant DMA for awkward HW sizes).
    n_splits = max(1, _cdiv(hw, budget_tile))
    hw_tile = min(_round_up(_cdiv(hw, n_splits), 128), budget_tile)

    # Guarantee >= 2 grid steps on a parallel axis when possible (v7x has 2 TCs).
    if _cdiv(n, bn) * _cdiv(hw, hw_tile) < 2 and hw > 128:
        hw_tile = max(128, _round_up(_cdiv(hw, 2), 128))

    grid = (_cdiv(n, bn), _cdiv(hw, hw_tile))

    x3 = x.reshape(n, c, hw)                              # contiguous view, free
    # Fold the 1/2 into the sigmoid-gated coefficients (fewer VPU ops in-kernel).
    coef = (0.5 + jax.nn.sigmoid(weight)).astype(jnp.float32)

    cost = pl.CostEstimate(
        flops=5 * n * c * hw,
        transcendentals=n * hw,                           # sqrt per output element
        bytes_accessed=n * c * hw * in_item + n * hw * out_item,
    )

    out2 = pl.pallas_call(
        _make_adpool_kernel(c, c_chunk, n_chunks),
        out_shape=jax.ShapeDtypeStruct((n, hw), x.dtype),
        grid=grid,
        in_specs=[
            pl.BlockSpec(memory_space=pltpu.SMEM),                    # coef (2,) scalars
            pl.BlockSpec((bn, c, hw_tile), lambda i, j: (i, 0, j)),   # x tile
        ],
        out_specs=pl.BlockSpec((bn, hw_tile), lambda i, j: (i, j)),   # lane/sublane-dense
        compiler_params=pltpu.CompilerParams(
            dimension_semantics=("parallel", "parallel"),
            vmem_limit_bytes=vmem_limit,
        ),
        cost_estimate=cost,
    )(coef, x3)

    return out2.reshape(n, 1, h, w)


def _reference(x, weight):
    """Pure-JAX reference matching torch semantics exactly (two-pass, ddof=1)."""
    xf = x.astype(jnp.float32)
    mean = jnp.mean(xf, axis=1, keepdims=True)
    std = jnp.sqrt(jnp.sum((xf - mean) ** 2, axis=1, keepdims=True) / (x.shape[1] - 1))
    wgt = jax.nn.sigmoid(weight.astype(jnp.float32))
    out = 0.5 * (std + mean) + wgt[0] * std + wgt[1] * mean
    return out.astype(x.dtype)


if __name__ == "__main__":
    key = jax.random.PRNGKey(0)
    kx, kw = jax.random.split(key)

    # Small shapes consistent with the module: N=2, C=4, H=W=16
    x = jax.random.normal(kx, (2, 4, 16, 16), dtype=jnp.float32)
    # nn.Parameter(torch.rand(2)) -> uniform [0, 1)
    weight = jax.random.uniform(kw, (2,), dtype=jnp.float32)

    out = adpool(x, weight)
    out = jax.block_until_ready(out)

    ref = _reference(x, weight)
    assert out.shape == (2, 1, 16, 16)
    assert out.dtype == x.dtype
    np.testing.assert_allclose(np.asarray(out), np.asarray(ref), rtol=1e-4, atol=1e-5)

    print("KERNEL_OK")
</pallas_src>

<mosaic_0001>
module attributes {stable_mosaic.version = 11 : i64} {
  func.func @kernel(%arg0: i32, %arg1: i32, %arg2: memref<2xf32, #tpu.memory_space<smem>>, %arg3: memref<2x4x128xf32, #tpu.memory_space<vmem>>, %arg4: memref<2x128xf32, #tpu.memory_space<vmem>>) attributes {dimension_semantics = [#tpu.dimension_semantics<parallel>, #tpu.dimension_semantics<parallel>], iteration_bounds = array<i64: 1, 2>, scalar_prefetch = 0 : i64, scratch_operands = 0 : i64, tpu.core_type = #tpu.core_type<tc>, window_params = [{transform_indices = @transform_0, window_bounds = array<i64: 2>}, {transform_indices = @transform_1, window_bounds = array<i64: 2, 4, 128>}, {transform_indices = @transform_2, window_bounds = array<i64: 2, 128>}]} {
    %c0 = arith.constant 0 : index
    %c0_0 = arith.constant 0 : index
    %c0_1 = arith.constant 0 : index
    %0 = vector.load %arg3[%c0, %c0_0, %c0_1] : memref<2x4x128xf32, #tpu.memory_space<vmem>>, vector<2x4x128xf32>
    %cst = arith.constant dense<0.000000e+00> : vector<2x128xf32>
    %1 = vector.multi_reduction <add>, %0, %cst [1] : vector<2x4x128xf32> to vector<2x128xf32>
    %cst_2 = arith.constant 2.500000e-01 : f32
    %2 = vector.broadcast %cst_2 : f32 to vector<2x128xf32>
    %3 = arith.mulf %1, %2 : vector<2x128xf32>
    %4 = vector.shape_cast %3 : vector<2x128xf32> to vector<2x1x128xf32>
    %5 = vector.broadcast %4 : vector<2x1x128xf32> to vector<2x4x128xf32>
    %6 = arith.subf %0, %5 : vector<2x4x128xf32>
    %7 = arith.mulf %6, %6 : vector<2x4x128xf32>
    %cst_3 = arith.constant dense<0.000000e+00> : vector<2x128xf32>
    %8 = vector.multi_reduction <add>, %7, %cst_3 [1] : vector<2x4x128xf32> to vector<2x128xf32>
    %cst_4 = arith.constant 0.333333343 : f32
    %9 = vector.broadcast %cst_4 : f32 to vector<2x128xf32>
    %10 = arith.mulf %8, %9 : vector<2x128xf32>
    %cst_5 = arith.constant 0.000000e+00 : f32
    %11 = vector.broadcast %cst_5 : f32 to vector<2x128xf32>
    %12 = arith.maximumf %10, %11 : vector<2x128xf32>
    %13 = math.sqrt %12 : vector<2x128xf32>
    %c0_6 = arith.constant 0 : index
    %14 = memref.load %arg2[%c0_6] : memref<2xf32, #tpu.memory_space<smem>>
    %15 = vector.broadcast %14 : f32 to vector<2x128xf32>
    %16 = arith.mulf %15, %13 : vector<2x128xf32>
    %c1 = arith.constant 1 : index
    %17 = memref.load %arg2[%c1] : memref<2xf32, #tpu.memory_space<smem>>
    %18 = vector.broadcast %17 : f32 to vector<2x128xf32>
    %19 = arith.mulf %18, %3 : vector<2x128xf32>
    %20 = arith.addf %16, %19 : vector<2x128xf32>
    %c0_7 = arith.constant 0 : index
    %c0_8 = arith.constant 0 : index
    %21 = vector.load %arg4[%c0_7, %c0_8] : memref<2x128xf32, #tpu.memory_space<vmem>>, vector<2x128xf32>
    tpu.vector_store %arg4[%c0_7, %c0_8], %20 {strides = array<i32>} : memref<2x128xf32, #tpu.memory_space<vmem>>, vector<2x128xf32>,
    return
  }
  func.func @transform_0(%arg0: i32, %arg1: i32) -> i32 {
    %c0_i32 = arith.constant 0 : i32
    %c0_i32_0 = arith.constant 0 : i32
    return %c0_i32 : i32
  }
  func.func @transform_1(%arg0: i32, %arg1: i32) -> (i32, i32, i32) {
    %c0_i32 = arith.constant 0 : i32
    %c0_i32_0 = arith.constant 0 : i32
    return %arg0, %c0_i32, %arg1 : i32, i32, i32
  }
  func.func @transform_2(%arg0: i32, %arg1: i32) -> (i32, i32) {
    %c0_i32 = arith.constant 0 : i32
    return %arg0, %arg1 : i32, i32
  }
}

</mosaic_0001>

<bundles_post_ra>
// kernel: tpu_custom_call.1
= control target key start
LH: loop header
LB: loop body
LE: loop exit
PB: predicated region body
PF: predicated region fallthrough
CT: control target
= control target key end

     0   :  { %7 = vsyncpa [#allocation5], 0  ;;  %s826_s0 = inlined_call_operand.hbm [shape: f32[2], index: 0, kind: input, shape index: {}]   ;;  %s827_s1 = inlined_call_operand.hbm [shape: f32[2,4,256], index: 1, kind: input, shape index: {}]   ;;  %s828_s2 = inlined_call_operand.hbm [shape: f32[2,256], index: 2, kind: output, shape index: {}]  }
   0x1   :  { %8 = vsyncpa [#allocation3], 0 }
   0x2   :  { %10 = vsyncpa [#allocation3 + $0x1], 0 }
   0x3   :  { %11 = vsyncpa [#allocation4], 0 }
   0x4   :  { %13 = vsyncpa [#allocation4 + $0x1], 0  ;;  %s622_s9 = smov 0   ;;  %s624_s10 = smov 0  }
   0x5   :  { %s626_s11 = smov 0   ;;  %s628_s12 = smov 0  }
   0x6   :  { %s630_s13 = smov 0   ;;  %s632_s14 = smov 0  }
   0x7 LB: > { %s374_s15 = sadd.s32 4294967295, %s599_s14   ;;  %s375_s16 = sadd.s32 4294967294, %s599_s14   ;;  %s599_s14 = sphi %s632_s14, %s19_s14   ;;  %s595_s13 = sphi %s630_s13, %s848_s13   ;;  %s591_s12 = sphi %s628_s12, %s847_s12   ;;  %s587_s11 = sphi %s626_s11, %s846_s11   ;;  %s583_s10 = sphi %s624_s10, %s845_s10   ;;  %s579_s9 = sphi %s622_s9, %s844_s9  }
   0x8   : > { %s61_s17 = sadd.s32 1, %s587_s11  ;;  %p68_p0 = scmp.ne.s32.totalorder %s587_s11, %s583_s10 }
   0x9   : > { %p69_p1 = scmp.eq.s32.totalorder %s599_s14, 0  ;;  %p74_p2 = scmp.ne.s32.totalorder %s583_s10, %s579_s9 }
   0xa   : > { %p660_p3 = scmp.eq.s32.totalorder %s374_s15, 0  ;;  %p100_p4 = scmp.eq.s32.totalorder %s374_s15, 1 }
   0xb   : > { %p70_p5 = por %p69_p1, %p68_p0  ;;  %p106_p6 = scmp.eq.s32.totalorder %s375_s16, 1 }
   0xc   : > { %s833_s18 = scalar_select %p660_p3, 1, 0 }
   0xd   : > { %p666_p7 = por %p660_p3, %p74_p2  ;;  %p670_p8 = por %p100_p4, %p68_p0 }
   0xe   : > { %p674_p9 = por %p106_p6, %p74_p2  ;;  %p376_p10 = scmp.ge.s32.totalorder %s599_s14, 1 }
   0xf   : > { %s834_s19 = scalar_select %p666_p7, 1, 0 }
  0x10   : > { %s835_s20 = scalar_select %p670_p8, 1, 0 }
  0x11   : > { %s836_s21 = scalar_select %p674_p9, 1, 0 }
  0x12   : > { %p113_p11 = scmp.lt.s32.totalorder %s599_s14, 3  ;;  %p411_p1 = scmp.lt.s32.totalorder %s599_s14, 2 }
  0x13   : > { %s135_s23 = sand.u32 1, %s587_s11   ;;  %s28_s25 = sadd.s32 1, %s595_s13 }
  0x14   : > { %p681_p13 = pnand %p376_p10, %p113_p11  ;;  %p689_p0 = pnand %p411_p1, %p70_p5 }
  0x15   : > { %s379_s26 = sshll.u32 %s135_s23, 3  ;;  %p29_p4 = scmp.ge.s32.totalorder %s28_s25, 2 }
  0x16   : > { %p398_p7 = pneg %p681_p13  ;;  %s470_s29 = scalar_lea.hbm %s826_s0, 16 }
  0x17   : > { %p471_p6 = scmp.ne.s32.totalorder %s826_s0, %s470_s29  ;;  %p477_p5 = scmp.lt.u32.totalorder %s470_s29, %s826_s0 }
  0x18   : > { %p399_p2 = pnand %p398_p7, %p660_p3 }
  0x1a   : > { %p472_p10 = pneg %p399_p2 }
  0x1c   : > { %p473_p11 = pnand %p472_p10, %p471_p6 }
  0x1e   : > { %p474_p12 = pneg %p473_p11 }
  0x20   : > { %p479_p1 = pnand %p477_p5, %p474_p12 }
  0x22   : > { %482 = shalt.err (!%p479_p1)
}
  0x23   : > { %s601_s6 = smov [#allocation2]   ;;  %s850_s25 = smov (%p29_p4, %s28_s25), 0 }
  0x24   : > { %401 = dma.hbm_to_smem (!%p399_p2), %s826_s0, 16, %s601_s6, [#allocation5]  }
  0x25   : > { %s380_s15 = sshll.u32 %s595_s13, 6  ;;  %s57_s16 = ssub.s32 %s595_s13, %s850_s25 }
  0x26   : > { %s716_s29 = scalar_lea.hbm %s827_s1, %s380_s15  ;;  %p59_p7 = scmp.eq.s32.totalorder %s57_s16, 0 }
  0x27   : > { %s139_s30 = scalar_lea.vmem [#allocation6], %s379_s26  ;;  %s725_s5 = scalar_lea.sflag [#allocation3], %s135_s23 }
  0x28   : > { %s148_s3 = sshll.u32 %s139_s30, 4  ;;  %s483_s6 = scalar_lea.hbm %s716_s29, 128  ;;  %s718_s3 = int_to_ptr.vmem [resolvable:$true] %s148_s3 }
  0x29   : > { %s723_s4 = scalar_select %p59_p7, %s587_s11, %s61_s17  }
  0x2a   : > { %p484_p12 = scmp.ne.s32.totalorder %s716_s29, %s483_s6  ;;  %p485_p2 = pneg %p689_p0 }
  0x2b   : > { %s488_s26 = scalar_lea.hbm %s827_s1, 256  ;;  %p489_p10 = scmp.lt.u32.totalorder %s716_s29, %s827_s1 }
  0x2c   : > { %p486_p4 = pnand %p485_p2, %p484_p12  ;;  %p490_p11 = scmp.lt.u32.totalorder %s488_s26, %s483_s6 }
  0x2d   : > { %p492_p1 = scmp.lt.u32.totalorder %s483_s6, %s716_s29 }
  0x2e   : > { %p487_p6 = pneg %p486_p4  ;;  %p491_p5 = por %p490_p11, %p489_p10 }
  0x30   : > { %p493_p7 = por %p492_p1, %p491_p5 }
  0x32   : > { %p494_p9 = pnand %p493_p7, %p487_p6 }
  0x34   : > { %497 = shalt.err (!%p494_p9)
}
  0x35   : > { %s498_s17 = scalar_lea.vmem %s718_s3, 128  ;;  %s602_s23 = smov [#allocation6]  }
  0x36   : > { %p499_p12 = scmp.ne.s32.totalorder %s718_s3, %s498_s17  ;;  %s503_s27 = sshll.u32 %s602_s23, 4  ;;  %s504_s27 = int_to_ptr.vmem [resolvable:$false] %s503_s27 }
  0x37   : > { %s505_s28 = scalar_lea.vmem %s504_s27, 256  ;;  %p506_p3 = scmp.lt.s32.totalorder %s718_s3, %s504_s27 }
  0x38   : > { %p501_p4 = pnand %p499_p12, %p485_p2  ;;  %p507_p10 = scmp.lt.s32.totalorder %s505_s28, %s498_s17 }
  0x3a   : > { %p502_p8 = pneg %p501_p4  ;;  %p508_p11 = por %p507_p10, %p506_p3 }
  0x3c   : > { %p509_p5 = pnand %p508_p11, %p502_p8 }
  0x3e   : > { %512 = shalt.err (!%p509_p5)
}
  0x3f   : > { %s603_s30 = smov 128   ;;  %s604_s6 = smov 64  }
  0x40   : > { %s605_s7 = smov 4   ;;  %160 = sbr.rel (%p681_p13) target bundleno = 150 (0x96), region = 28 }
  0x41   : > { %405 = dma.hbm_to_vmem [thread:$0]  (!%p689_p0), %s716_s29, 128, %s718_s3, %s725_s5, %s603_s30, %s604_s6, %s605_s7  }
  0x42   : > { %p839_p9 = scmp.ne.s32.totalorder (!%p681_p13), %s833_s18, 0 }
  0x47   : > { %566 = dma.done.wait (%p839_p9), [#allocation5], 16  }
  0x48   : > { %568 = vsyncadd (%p839_p9), [#allocation5], 4294967280  ;;  %s760_s8 = sand.u32 1, %s583_s10   ;;  %p840_p3 = scmp.ne.s32.totalorder %s834_s19, 0 }
  0x49   : > { %s383_s26 = sshll.u32 %s760_s8, 3  ;;  %s167_s15 = scalar_lea.sflag [#allocation3], %s760_s8 }
  0x4a   : > { %s170_s16 = scalar_lea.vmem [#allocation6], %s383_s26 }
  0x4b   : > { %570 = dma.done.wait (%p840_p3), %s167_s15, 128  }
  0x4c   : > { %572 = vsyncadd (%p840_p3), %s167_s15, 4294967168 }
  0x4d   : > { %175 = sfence }
  0x4e   : > { %v193_v0 = vld [vmem:[%s170_s16] sm:$0xf]  ;;  %v194_v1 = vld [vmem:[%s170_s16 + $0x4] sm:$0xf]  ;;  %vm195_vm0 = vcmask 1043456   ;;  %s385_s18 = sld [smem:[#allocation2 + $0x1]] }
  0x4f   : > { %v196_v2 = vsel %vm195_vm0, %v193_v0, 0.0  ;;  %v203_v3 = vsel %vm195_vm0, %v194_v1, 0.0  ;;  %s248_s19 = sld [smem:[#allocation2]]  ;;  %s384_s22 = sshll.u32 %s760_s8, 1  ;;  %vm260_vm5 = vcmask 1041409  }
  0x50   : > { %v197_v4 = vrot.slane %v196_v2, 4  ;;  %v204_v5 = vrot.slane %v203_v3, 4  ;;  %s191_s24 = scalar_lea.vmem [#allocation7], %s384_s22  ;;  %s387_s3 = sshll.u32 %s591_s12, 5 }
  0x51   : > { %s280_s29 = sshll.u32 %s191_s24, 4  ;;  %s779_s23 = scalar_lea.hbm %s828_s2, %s387_s3  ;;  %s774_s29 = int_to_ptr.vmem [resolvable:$true] %s280_s29 }
  0x52   : > { %v198_v6 = vadd.f32 %v197_v4, %v196_v2  ;;  %v205_v7 = vadd.f32 %v204_v5, %v203_v3  ;;  %s265_s27 = scalar_lea.sflag [#allocation4], %s760_s8  ;;  %s513_s28 = scalar_lea.vmem %s774_s29, 32 }
  0x53   : > { %p514_p8 = scmp.ne.s32.totalorder %s774_s29, %s513_s28  ;;  %p841_p13 = scmp.ne.s32.totalorder %s835_s20, 0 }
  0x54   : > { %v199_v8 = vrot.slane %v198_v6, 2  ;;  %v206_v9 = vrot.slane %v205_v7, 2  ;;  %v253_v42 = vstv %s385_s18  ;;  %s606_s12 = smov [#allocation7]  }
  0x55   : > { %v249_v47 = vstv %s248_s19  ;;  %p515_p0 = pnand %p514_p8, %p841_p13  ;;  %s517_s30 = sshll.u32 %s606_s12, 4  ;;  %s518_s30 = int_to_ptr.vmem [resolvable:$false] %s517_s30 }
  0x56   : > { %v200_v10 = vadd.f32 %v199_v8, %v198_v6  ;;  %v207_v11 = vadd.f32 %v206_v9, %v205_v7  ;;  %s519_s6 = scalar_lea.vmem %s518_s30, 64  ;;  %p520_p6 = scmp.lt.s32.totalorder %s774_s29, %s518_s30 }
  0x57   : > { %p516_p2 = pneg %p515_p0  ;;  %p521_p1 = scmp.lt.s32.totalorder %s519_s6, %s513_s28 }
  0x58   : > { %v201_v12 = vrot.slane %v200_v10, 1  ;;  %v208_v13 = vrot.slane %v207_v11, 1 }
  0x59   : > { %p522_p7 = por %p521_p1, %p520_p6 }
  0x5a   : > { %v202_v14 = vadd.f32 %v201_v12, %v200_v10  ;;  %v209_v15 = vadd.f32 %v208_v13, %v207_v11 }
  0x5b   : > { %p523_p12 = pnand %p522_p7, %p516_p2 }
  0x5c   : > { %v210_v16 = vmul.f32 0.25, %v202_v14  ;;  %v211_v17 = vmul.f32 0.25, %v209_v15 }
  0x5e   : > { %v212_v18 = vsub.f32 %v193_v0, %v210_v16  ;;  %v213_v19 = vsub.f32 %v194_v1, %v211_v17  ;;  %v254_v49 = vmul.f32 %v253_v42, %v210_v16  ;;  %v255_v52 = vmul.f32 %v253_v42, %v211_v17 }
  0x60   : > { %v214_v20 = vmul.f32 %v212_v18, %v212_v18  ;;  %v215_v21 = vmul.f32 %v213_v19, %v213_v19 }
  0x62   : > { %v216_v22 = vsel %vm195_vm0, %v214_v20, 0.0  ;;  %v223_v23 = vsel %vm195_vm0, %v215_v21, 0.0 }
  0x63   : > { %v217_v24 = vrot.slane %v216_v22, 4  ;;  %v224_v25 = vrot.slane %v223_v23, 4 }
  0x65   : > { %v218_v26 = vadd.f32 %v217_v24, %v216_v22  ;;  %v225_v27 = vadd.f32 %v224_v25, %v223_v23 }
  0x67   : > { %v219_v28 = vrot.slane %v218_v26, 2  ;;  %v226_v29 = vrot.slane %v225_v27, 2 }
  0x69   : > { %v220_v30 = vadd.f32 %v219_v28, %v218_v26  ;;  %v227_v31 = vadd.f32 %v226_v29, %v225_v27 }
  0x6b   : > { %v221_v32 = vrot.slane %v220_v30, 1  ;;  %v228_v33 = vrot.slane %v227_v31, 1 }
  0x6d   : > { %v222_v34 = vadd.f32 %v221_v32, %v220_v30  ;;  %v229_v35 = vadd.f32 %v228_v33, %v227_v31 }
  0x6f   : > { %v230_v36 = vmul.f32 0.33333334, %v222_v34  ;;  %v231_v37 = vmul.f32 0.33333334, %v229_v35 }
  0x71   : > { %v232_v38 = vmax.f32 %v230_v36, 0.0  ;;  %v233_v39 = vmax.f32 %v231_v37, 0.0 }
  0x73   : > { %466 = vrsqrt.f32 %v232_v38  ;;  %vm236_vm1 = vcmp.eq.f32.partialorder %v232_v38, inf  ;;  %v239_v41 = vand.u32 2147483648, %v232_v38  ;;  %vm238_vm2 = vcmp.eq.f32.partialorder %v232_v38, 0.0 }
  0x74   : > { %468 = vrsqrt.f32 %v233_v39  ;;  %vm243_vm3 = vcmp.eq.f32.partialorder %v233_v39, inf  ;;  %v246_v45 = vand.u32 2147483648, %v233_v39  ;;  %vm245_vm4 = vcmp.eq.f32.partialorder %v233_v39, 0.0 }
  0x7d   : > { %v467_v40 = vpop.eup %466 }
  0x7e   : > { %v469_v43 = vpop.eup %468  ;;  %v235_v44 = vmul.f32 %v467_v40, %v232_v38 }
  0x7f   : > { %v242_v46 = vmul.f32 %v469_v43, %v233_v39 }
  0x80   : > { %v237_v48 = vsel %vm236_vm1, %v232_v38, %v235_v44 }
  0x81   : > { %v240_v50 = vsel %vm238_vm2, %v239_v41, %v237_v48  ;;  %v244_v51 = vsel %vm243_vm3, %v233_v39, %v242_v46 }
  0x82   : > { %v247_v53 = vsel %vm245_vm4, %v246_v45, %v244_v51  ;;  %v250_v54 = vmul.f32 %v249_v47, %v240_v50 }
  0x83   : > { %v251_v55 = vmul.f32 %v249_v47, %v247_v53 }
  0x84   : > { %v256_v56 = vadd.f32 %v254_v49, %v250_v54 }
  0x85   : > { %v257_v57 = vadd.f32 %v255_v52, %v251_v55 }
  0x87   : > { %v261_v58 = vsel %vm260_vm5, %v257_v57, %v256_v56 }
  0x88   : > { %263 = vst [vmem:[%s191_s24] sm:$0x3] %v261_v58 }
  0x89   : > { %526 = shalt.err (!%p523_p12)
}
  0x8a   : > { %s527_s7 = scalar_lea.hbm %s779_s23, 32  ;;  %s531_s15 = scalar_lea.hbm %s828_s2, 64 }
  0x8b   : > { %p528_p4 = scmp.ne.s32.totalorder %s779_s23, %s527_s7  ;;  %p532_p5 = scmp.lt.u32.totalorder %s779_s23, %s828_s2 }
  0x8c   : > { %p533_p9 = scmp.lt.u32.totalorder %s531_s15, %s527_s7  ;;  %p535_p8 = scmp.lt.u32.totalorder %s527_s7, %s779_s23 }
  0x8d   : > { %p529_p10 = pnand %p528_p4, %p841_p13 }
  0x8e   : > { %p534_p3 = por %p533_p9, %p532_p5 }
  0x8f   : > { %p530_p11 = pneg %p529_p10 }
  0x90   : > { %p536_p0 = por %p535_p8, %p534_p3 }
  0x92   : > { %p537_p2 = pnand %p536_p0, %p530_p11 }
  0x94   : > { %540 = shalt.err (!%p537_p2)
}
  0x95   : > { %396 = dma.vmem_to_hbm [thread:$0]  (%p841_p13), %s774_s29, 32, %s779_s23, %s265_s27  }
  0x96 PF: > { %s292_s19 = sand.u32 1, %s579_s9   ;;  %p842_p6 = scmp.ne.s32.totalorder %s836_s21, 0 }
  0x97   : > { %p843_p1 = scmp.ge.s32.totalorder %s599_s14, 2  ;;  %s293_s22 = scalar_lea.sflag [#allocation4], %s292_s19 }
  0x99   : > { %p407_p7 = pnand %p843_p1, %p842_p6 }
  0x9b   : > { %574 = dma.done.wait (!%p407_p7), %s293_s22, 32  }
  0x9c   : > { %576 = vsyncadd (!%p407_p7), %s293_s22, 4294967264  ;;  %s19_s14 = sadd.s32 1, %s599_s14   ;;  %s844_s9 = smov %s583_s10 }
  0x9d   : > { %p16_p12 = scmp.ge.s32.totalorder %s19_s14, 4   ;;  %s845_s10 = smov %s587_s11 }
  0x9e   : > { %s846_s11 = smov %s723_s4  ;;  %s847_s12 = smov %s595_s13 }
  0x9f   : > { %s848_s13 = smov %s850_s25  ;;  %18 = sbr.rel (!%p16_p12) target bundleno = 7 (0x7), region = 78 }
  0xa6   :  { %298 = vsyncpa [#allocation3], 1 }
  0xa7   :  { %300 = vsyncpa [#allocation3 + $0x1], 1 }
  0xa8   :  { %301 = vsyncpa [#allocation4], 1 }
  0xa9   :  { %303 = vsyncpa [#allocation4 + $0x1], 1 }
  0xaa   :  { %304 = vsyncpa [#allocation5], 1 }
  0xab   :  { %306 = vsyncpa [#allocation5 + $0x1], 1 }

</bundles_post_ra>
